<compile_context>
chip_gen: v7x
topology: tpu7x:2x2x1
jax: 0.10.0
libtpu: 0.0.40
codegen_flags: <defaults>
</compile_context>

<pallas_src>
import jax
import jax.numpy as jnp
from jax.experimental import pallas as pl
from jax.experimental.pallas import tpu as pltpu


# ---------------------------------------------------------------------------
# Kernels
# ---------------------------------------------------------------------------

def _gate(y, w1t, w2t):
    """y: (TB, C) f32; w1t: (C, H) f32; w2t: (H, C) f32 -> sigmoid gate (TB, C) f32."""
    h = jnp.dot(y, w1t, preferred_element_type=jnp.float32)
    h = jnp.maximum(h, 0.0)
    s = jnp.dot(h, w2t, preferred_element_type=jnp.float32)
    return jax.nn.sigmoid(s)


def se_kernel_direct(x_ref, w1t_ref, w2t_ref, o_ref):
    # x_ref: (TB, C, L) in the native layout (used when L is lane-aligned or the
    # pooling/expansion matrices would not fit VMEM).
    x = x_ref[...]
    y = jnp.mean(x.astype(jnp.float32), axis=2)                 # (TB, C)
    s = _gate(y, w1t_ref[...], w2t_ref[...])                    # (TB, C) f32
    o_ref[...] = (x * s.astype(x.dtype)[:, :, None]).astype(o_ref.dtype)


def se_kernel_flat(x_ref, pool_ref, expand_ref, w1t_ref, w2t_ref, o_ref):
    # x_ref: (TB, C*L) -- lane-dense loads/stores.  Pooling and gate expansion
    # are tiny MXU matmuls, so no cross-lane relayout / masked stores.
    x = x_ref[...]
    xf = x.astype(jnp.float32)
    y = jnp.dot(xf, pool_ref[...], preferred_element_type=jnp.float32)   # (TB, C)   mean
    s = _gate(y, w1t_ref[...], w2t_ref[...])                             # (TB, C)
    g = jnp.dot(s, expand_ref[...], preferred_element_type=jnp.float32)  # (TB, C*L) gate
    o_ref[...] = (xf * g).astype(o_ref.dtype)


# ---------------------------------------------------------------------------
# Wrapper
# ---------------------------------------------------------------------------

_BLOCK_BYTES_CAP = 2 * 1024 * 1024        # per x block (double-buffered in + out)
_FLAT_MATRIX_BYTES_CAP = 1 * 1024 * 1024  # max size of each pooling/expansion matrix
_VMEM_LIMIT_BYTES = 32 * 1024 * 1024      # safe on v5e/v6e (128 MiB) and v7x (64 MiB)


def se_layer(x, w1, w2, *, flat_matrix_bytes_cap=_FLAT_MATRIX_BYTES_CAP):
    """x: (B, C, L); w1: (C//r, C); w2: (C, C//r) (nn.Linear layout). -> (B, C, L)."""
    B, C, L = x.shape
    H = w1.shape[0]
    itemsize = jnp.dtype(x.dtype).itemsize

    # Hoist weight transposes (and the f32 cast) out of the kernel.
    w1t = jnp.transpose(w1).astype(jnp.float32)    # (C, H)
    w2t = jnp.transpose(w2).astype(jnp.float32)    # (H, C)

    bytes_per_sample = max(1, C * L * itemsize)
    tb_raw = max(1, _BLOCK_BYTES_CAP // bytes_per_sample)

    matrix_bytes = C * L * C * 4
    use_flat = (
        (L % 128 != 0)
        and (matrix_bytes <= flat_matrix_bytes_cap)
        and (tb_raw >= B or tb_raw >= 8)     # flat block's sublane dim must be 8-aligned
    )

    compiler_params = pltpu.CompilerParams(
        dimension_semantics=("parallel",),
        vmem_limit_bytes=_VMEM_LIMIT_BYTES,
    )

    if use_flat:
        # Lane-dense path: flatten (B, C, L) -> (B, C*L) (free, contiguous).
        tb = B if tb_raw >= B else (tb_raw // 8) * 8
        x_flat = jnp.reshape(x, (B, C * L))
        expand = jnp.kron(jnp.eye(C, dtype=jnp.float32),
                          jnp.ones((1, L), jnp.float32))          # (C, C*L): E[c, c*L+l]=1
        pool = jnp.transpose(expand) * jnp.float32(1.0 / L)        # (C*L, C): P[c*L+l, c]=1/L

        cost = pl.CostEstimate(
            flops=4 * B * C * C * L + 4 * B * C * H + B * C * L,
            transcendentals=B * C,
            bytes_accessed=2 * B * C * L * itemsize + 2 * matrix_bytes,
        )
        out = pl.pallas_call(
            se_kernel_flat,
            out_shape=jax.ShapeDtypeStruct((B, C * L), x.dtype),
            grid_spec=pltpu.PrefetchScalarGridSpec(
                num_scalar_prefetch=0,
                grid=(pl.cdiv(B, tb),),
                in_specs=[
                    pl.BlockSpec((tb, C * L), lambda b: (b, 0)),
                    pl.BlockSpec((C * L, C), lambda b: (0, 0)),
                    pl.BlockSpec((C, C * L), lambda b: (0, 0)),
                    pl.BlockSpec((C, H), lambda b: (0, 0)),
                    pl.BlockSpec((H, C), lambda b: (0, 0)),
                ],
                out_specs=pl.BlockSpec((tb, C * L), lambda b: (b, 0)),
            ),
            compiler_params=compiler_params,
            cost_estimate=cost,
        )(x_flat, pool, expand, w1t, w2t)
        return jnp.reshape(out, (B, C, L))

    # Direct path: native (B, C, L) layout, C and L whole per block.
    tb = max(1, min(B, tb_raw))
    cost = pl.CostEstimate(
        flops=2 * B * C * L + 4 * B * C * H,
        transcendentals=B * C,
        bytes_accessed=2 * B * C * L * itemsize + 2 * C * H * 4,
    )
    return pl.pallas_call(
        se_kernel_direct,
        out_shape=jax.ShapeDtypeStruct((B, C, L), x.dtype),
        grid_spec=pltpu.PrefetchScalarGridSpec(
            num_scalar_prefetch=0,
            grid=(pl.cdiv(B, tb),),
            in_specs=[
                pl.BlockSpec((tb, C, L), lambda b: (b, 0, 0)),
                pl.BlockSpec((C, H), lambda b: (0, 0)),
                pl.BlockSpec((H, C), lambda b: (0, 0)),
            ],
            out_specs=pl.BlockSpec((tb, C, L), lambda b: (b, 0, 0)),
        ),
        compiler_params=compiler_params,
        cost_estimate=cost,
    )(x, w1t, w2t)


# ---------------------------------------------------------------------------
# Pure-JAX reference (matches the PyTorch module)
# ---------------------------------------------------------------------------

def se_layer_ref(x, w1, w2):
    y = jnp.mean(x, axis=-1)                           # (B, C)
    h = jnp.maximum(y @ w1.T, 0.0)                     # (B, H)
    s = jax.nn.sigmoid(h @ w2.T)                       # (B, C)
    return x * s[:, :, None]


if __name__ == "__main__":
    key = jax.random.PRNGKey(0)

    # (B, C, L, reduction, flat_matrix_bytes_cap override)
    cases = [
        (2, 16, 16, 8, None),   # L not lane-aligned -> flat (MXU pooling/expansion) path
        (2, 16, 128, 8, None),  # L lane-aligned     -> direct path, lane-dense stores
        (2, 16, 24, 8, 0),      # direct path forced with unaligned L (masked-store path)
    ]
    for (B, C, L, r, cap) in cases:
        H = max(1, C // r)
        kx, k1, k2, key = jax.random.split(key, 4)
        x = jax.random.normal(kx, (B, C, L), dtype=jnp.float32)
        # Deterministic synthetic weights (nn.Linear layout: (out, in), no bias).
        w1 = jax.random.normal(k1, (H, C), dtype=jnp.float32) * (1.0 / (C ** 0.5))
        w2 = jax.random.normal(k2, (C, H), dtype=jnp.float32) * (1.0 / (H ** 0.5))

        kwargs = {} if cap is None else {"flat_matrix_bytes_cap": cap}
        out = jax.block_until_ready(se_layer(x, w1, w2, **kwargs))
        ref = se_layer_ref(x, w1, w2)
        assert out.shape == (B, C, L), (out.shape, (B, C, L))
        assert jnp.allclose(out, ref, atol=1e-4, rtol=1e-4), (B, C, L)

    print("KERNEL_OK")
</pallas_src>

<mosaic_0001>
module attributes {stable_mosaic.version = 11 : i64} {
  func.func @se_kernel_flat(%arg0: i32, %arg1: memref<2x256xf32, #tpu.memory_space<vmem>>, %arg2: memref<256x16xf32, #tpu.memory_space<vmem>>, %arg3: memref<16x256xf32, #tpu.memory_space<vmem>>, %arg4: memref<16x2xf32, #tpu.memory_space<vmem>>, %arg5: memref<2x16xf32, #tpu.memory_space<vmem>>, %arg6: memref<2x256xf32, #tpu.memory_space<vmem>>) attributes {dimension_semantics = [#tpu.dimension_semantics<parallel>], iteration_bounds = array<i64: 1>, scalar_prefetch = 0 : i64, scratch_operands = 0 : i64, tpu.core_type = #tpu.core_type<tc>, window_params = [{transform_indices = @transform_0, window_bounds = array<i64: 2, 256>}, {pipeline_mode = #tpu.pipeline_mode<synchronous>, transform_indices = @transform_1, window_bounds = array<i64: 256, 16>}, {pipeline_mode = #tpu.pipeline_mode<synchronous>, transform_indices = @transform_2, window_bounds = array<i64: 16, 256>}, {pipeline_mode = #tpu.pipeline_mode<synchronous>, transform_indices = @transform_3, window_bounds = array<i64: 16, 2>}, {pipeline_mode = #tpu.pipeline_mode<synchronous>, transform_indices = @transform_4, window_bounds = array<i64: 2, 16>}, {transform_indices = @transform_5, window_bounds = array<i64: 2, 256>}]} {
    %c0 = arith.constant 0 : index
    %c0_0 = arith.constant 0 : index
    %0 = vector.load %arg1[%c0, %c0_0] : memref<2x256xf32, #tpu.memory_space<vmem>>, vector<2x256xf32>
    %c0_1 = arith.constant 0 : index
    %c0_2 = arith.constant 0 : index
    %1 = vector.load %arg2[%c0_1, %c0_2] : memref<256x16xf32, #tpu.memory_space<vmem>>, vector<256x16xf32>
    %cst = arith.constant dense<0.000000e+00> : vector<2x16xf32>
    %2 = tpu.matmul %0, %1, %cst {dimension_numbers = #tpu.dot_dimension_numbers<[1], [0], [0], [1], [0, 0, 1, 1], [], []>} : vector<2x256xf32>, vector<256x16xf32>, vector<2x16xf32> -> vector<2x16xf32>
    %c0_3 = arith.constant 0 : index
    %c0_4 = arith.constant 0 : index
    %3 = vector.load %arg4[%c0_3, %c0_4] : memref<16x2xf32, #tpu.memory_space<vmem>>, vector<16x2xf32>
    %c0_5 = arith.constant 0 : index
    %c0_6 = arith.constant 0 : index
    %4 = vector.load %arg5[%c0_5, %c0_6] : memref<2x16xf32, #tpu.memory_space<vmem>>, vector<2x16xf32>
    %cst_7 = arith.constant dense<0.000000e+00> : vector<2x2xf32>
    %5 = tpu.matmul %2, %3, %cst_7 {dimension_numbers = #tpu.dot_dimension_numbers<[1], [0], [0], [1], [0, 0, 1, 1], [], []>} : vector<2x16xf32>, vector<16x2xf32>, vector<2x2xf32> -> vector<2x2xf32>
    %cst_8 = arith.constant 0.000000e+00 : f32
    %6 = vector.broadcast %cst_8 : f32 to vector<2x2xf32>
    %7 = arith.maximumf %5, %6 : vector<2x2xf32>
    %cst_9 = arith.constant dense<0.000000e+00> : vector<2x16xf32>
    %8 = tpu.matmul %7, %4, %cst_9 {dimension_numbers = #tpu.dot_dimension_numbers<[1], [0], [0], [1], [0, 0, 1, 1], [], []>} : vector<2x2xf32>, vector<2x16xf32>, vector<2x16xf32> -> vector<2x16xf32>
    %9 = arith.negf %8 : vector<2x16xf32>
    %10 = math.exp %9 : vector<2x16xf32>
    %cst_10 = arith.constant 1.000000e+00 : f32
    %11 = vector.broadcast %cst_10 : f32 to vector<2x16xf32>
    %12 = arith.addf %11, %10 : vector<2x16xf32>
    %13 = arith.divf %11, %12 : vector<2x16xf32>
    %c0_11 = arith.constant 0 : index
    %c0_12 = arith.constant 0 : index
    %14 = vector.load %arg3[%c0_11, %c0_12] : memref<16x256xf32, #tpu.memory_space<vmem>>, vector<16x256xf32>
    %cst_13 = arith.constant dense<0.000000e+00> : vector<2x256xf32>
    %15 = tpu.matmul %13, %14, %cst_13 {dimension_numbers = #tpu.dot_dimension_numbers<[1], [0], [0], [1], [0, 0, 1, 1], [], []>} : vector<2x16xf32>, vector<16x256xf32>, vector<2x256xf32> -> vector<2x256xf32>
    %16 = arith.mulf %0, %15 : vector<2x256xf32>
    %c0_14 = arith.constant 0 : index
    %c0_15 = arith.constant 0 : index
    %17 = vector.load %arg6[%c0_14, %c0_15] : memref<2x256xf32, #tpu.memory_space<vmem>>, vector<2x256xf32>
    tpu.vector_store %arg6[%c0_14, %c0_15], %16 {strides = array<i32>} : memref<2x256xf32, #tpu.memory_space<vmem>>, vector<2x256xf32>,
    return
  }
  func.func @transform_0(%arg0: i32) -> (i32, i32) {
    %c0_i32 = arith.constant 0 : i32
    %c0_i32_0 = arith.constant 0 : i32
    return %arg0, %c0_i32 : i32, i32
  }
  func.func @transform_1(%arg0: i32) -> (i32, i32) {
    %c0_i32 = arith.constant 0 : i32
    %c0_i32_0 = arith.constant 0 : i32
    %c0_i32_1 = arith.constant 0 : i32
    return %c0_i32, %c0_i32_0 : i32, i32
  }
  func.func @transform_2(%arg0: i32) -> (i32, i32) {
    %c0_i32 = arith.constant 0 : i32
    %c0_i32_0 = arith.constant 0 : i32
    %c0_i32_1 = arith.constant 0 : i32
    return %c0_i32, %c0_i32_0 : i32, i32
  }
  func.func @transform_3(%arg0: i32) -> (i32, i32) {
    %c0_i32 = arith.constant 0 : i32
    %c0_i32_0 = arith.constant 0 : i32
    %c0_i32_1 = arith.constant 0 : i32
    return %c0_i32, %c0_i32_0 : i32, i32
  }
  func.func @transform_4(%arg0: i32) -> (i32, i32) {
    %c0_i32 = arith.constant 0 : i32
    %c0_i32_0 = arith.constant 0 : i32
    %c0_i32_1 = arith.constant 0 : i32
    return %c0_i32, %c0_i32_0 : i32, i32
  }
  func.func @transform_5(%arg0: i32) -> (i32, i32) {
    %c0_i32 = arith.constant 0 : i32
    %c0_i32_0 = arith.constant 0 : i32
    return %arg0, %c0_i32 : i32, i32
  }
}

</mosaic_0001>

<bundles_post_ra>
// kernel: tpu_custom_call.1
= control target key start
LH: loop header
LB: loop body
LE: loop exit
PB: predicated region body
PF: predicated region fallthrough
CT: control target
= control target key end

     0   :  { %v58_v3 = vlaneseq  ;;  %v531_v8 = vmov 1983009808   ;;  %s708_s0 = inlined_call_operand.vmem [shape: f32[2,256], index: 0, kind: input, shape index: {}]   ;;  %s709_s1 = inlined_call_operand.vmem [shape: f32[256,16], index: 1, kind: input, shape index: {}]   ;;  %s710_s2 = inlined_call_operand.vmem [shape: f32[16,256], index: 2, kind: input, shape index: {}]   ;;  %s711_s3 = inlined_call_operand.vmem [shape: f32[16,2], index: 3, kind: input, shape index: {}]   ;;  %s712_s4 = inlined_call_operand.vmem [shape: f32[2,16], index: 4, kind: input, shape index: {}]   ;;  %s713_s5 = inlined_call_operand.hbm [shape: f32[2,256], index: 5, kind: output, shape index: {}]  }
   0x1   :  { %v38_v0 = vld [vmem:[%s709_s1 + $0x80] sm:$0xff]  ;;  %v39_v1 = vld [vmem:[%s709_s1 + $0x88] sm:$0xff]  ;;  %v40_v6 = vld [vmem:[%s709_s1 + $0x90] sm:$0xff]  ;;  %v56_v9 = vunpack.c.l.s4 %v531_v8 }
   0x2   :  { %v22_v2 = vld [vmem:[%s709_s1] sm:$0xff]  ;;  %v459_v4 = vpack.c.bf16 %v39_v1, %v38_v0  ;;  %v23_v5 = vld [vmem:[%s709_s1 + $0x8] sm:$0xff]  ;;  %v41_v7 = vld [vmem:[%s709_s1 + $0x98] sm:$0xff]  ;;  %v59_v17 = vshrl.u32 %v58_v3, 7 }
   0x3   :  { %v461_v10 = vpack.c.bf16 %v23_v5, %v22_v2  ;;  %v463_v11 = vpack.c.bf16 %v41_v7, %v40_v6  ;;  %v24_v12 = vld [vmem:[%s709_s1 + $0x10] sm:$0xff]  ;;  %v25_v13 = vld [vmem:[%s709_s1 + $0x18] sm:$0xff]  ;;  %v42_v14 = vld [vmem:[%s709_s1 + $0xa0] sm:$0xff]  ;;  %v57_v16 = vunpack.c.0.s8 %v56_v9 }
   0x4   :  { %460 = vmatprep.subr.bf16.mxu0 %v459_v4  ;;  %v43_v15 = vld [vmem:[%s709_s1 + $0xa8] sm:$0xff]  ;;  %v465_v18 = vpack.c.bf16 %v25_v13, %v24_v12  ;;  %v26_v20 = vld [vmem:[%s709_s1 + $0x20] sm:$0xff]  ;;  %v44_v22 = vld [vmem:[%s709_s1 + $0xb0] sm:$0xff] }
   0x5   :  { %462 = vmatpush3.bf16.msra.mxu0 %v461_v10  ;;  %v467_v19 = vpack.c.bf16 %v43_v15, %v42_v14  ;;  %v27_v21 = vld [vmem:[%s709_s1 + $0x28] sm:$0xff]  ;;  %v45_v23 = vld [vmem:[%s709_s1 + $0xb8] sm:$0xff]  ;;  %v608_v24 = vsub.s32 %v57_v16, %v59_v17  ;;  %v28_v27 = vld [vmem:[%s709_s1 + $0x30] sm:$0xff] }
   0x6   :  { %464 = vmatprep.subr.bf16.mxu0 %v463_v11  ;;  %v469_v25 = vpack.c.bf16 %v27_v21, %v26_v20  ;;  %v471_v26 = vpack.c.bf16 %v45_v23, %v44_v22  ;;  %v29_v28 = vld [vmem:[%s709_s1 + $0x38] sm:$0xff]  ;;  %v46_v29 = vld [vmem:[%s709_s1 + $0xc0] sm:$0xff]  ;;  %v47_v30 = vld [vmem:[%s709_s1 + $0xc8] sm:$0xff] }
   0x7   :  { %v625_v31 = vld [vmem:[%s708_s0] sm:$0xf] }
   0x8   :  { %v61_v32 = vrot.slane %v625_v31, %v608_v24 }
   0x9   :  { %466 = vmatpush3.bf16.msra.mxu0 %v465_v18 }
   0xa   :  { %468 = vmatprep.subr.bf16.mxu0 %v467_v19 }
   0xb   :  { %10 = vsyncpa [#allocation3], 0  ;;  %v473_v33 = vpack.c.bf16 %v29_v28, %v28_v27  ;;  %v475_v34 = vpack.c.bf16 %v47_v30, %v46_v29  ;;  %v30_v35 = vld [vmem:[%s709_s1 + $0x40] sm:$0xff]  ;;  %v31_v36 = vld [vmem:[%s709_s1 + $0x48] sm:$0xff]  ;;  %v62_v37 = vcombine.high %v61_v32, %v61_v32  ;;  %v532_v60 = vmov 0.0|0.0   ;;  %s535_s18 = smov [#allocation2]  }
   0xc   :  { %v48_v38 = vld [vmem:[%s709_s1 + $0xd0] sm:$0xff]  ;;  %v49_v39 = vld [vmem:[%s709_s1 + $0xd8] sm:$0xff]  ;;  %v477_v40 = vpack.c.bf16 %v31_v36, %v30_v35  ;;  %v50_v44 = vld [vmem:[%s709_s1 + $0xe0] sm:$0xff]  ;;  %491 = vmatprep.subr.bf16.mxu1 %v532_v60  ;;  %vm533_vm0 = vmmov 0   ;;  %v534_v61 = vmov 0.0   ;;  %vm138_vm1 = vcmask 130048  }
   0xd   :  { %470 = vmatpush3.bf16.msra.mxu0 %v469_v25  ;;  %129 = vmatprep.mubr.f32.mxu0 %v62_v37  ;;  %v479_v41 = vpack.c.bf16 %v49_v39, %v48_v38  ;;  %v32_v42 = vld [vmem:[%s709_s1 + $0x50] sm:$0xff]  ;;  %v33_v43 = vld [vmem:[%s709_s1 + $0x58] sm:$0xff]  ;;  %v51_v45 = vld [vmem:[%s709_s1 + $0xe8] sm:$0xff]  ;;  %vm217_vm2 = vcmask 1041408   ;;  %vm213_vm3 = vcmask 15360   ;;  %s394_s19 = sshll.u32 %s535_s18, 4  ;;  %s395_s19 = int_to_ptr.vmem [resolvable:$true] %s394_s19 }
   0xe   :  { %472 = vmatprep.subr.bf16.mxu0 %v471_v26  ;;  %v481_v46 = vpack.c.bf16 %v33_v43, %v32_v42  ;;  %v483_v47 = vpack.c.bf16 %v51_v45, %v50_v44  ;;  %v34_v48 = vld [vmem:[%s709_s1 + $0x60] sm:$0xff]  ;;  %v35_v49 = vld [vmem:[%s709_s1 + $0x68] sm:$0xff]  ;;  %v52_v50 = vld [vmem:[%s709_s1 + $0xf0] sm:$0xff]  ;;  %451 = vmatprep.mubr.msk.f32.mxu1 %vm533_vm0, %v534_v61  ;;  %p512_p1 = scmp.lt.s32.totalorder %s395_s19, %s395_s19 }
   0xf   :  { %v53_v51 = vld [vmem:[%s709_s1 + $0xf8] sm:$0xff]  ;;  %v485_v52 = vpack.c.bf16 %v35_v49, %v34_v48  ;;  %v36_v54 = vld [vmem:[%s709_s1 + $0x70] sm:$0xff]  ;;  %v135_v57 = vld [vmem:[%s711_s3] sm:$0xff] }
  0x10   :  { %v487_v53 = vpack.c.bf16 %v53_v51, %v52_v50  ;;  %v37_v55 = vld [vmem:[%s709_s1 + $0x78] sm:$0xff]  ;;  %v136_v58 = vld [vmem:[%s711_s3 + $0x8] sm:$0xff]  ;;  %v137_v1 = vld [vmem:[%s712_s4] sm:$0x3] }
  0x11   :  { %474 = vmatpush3.bf16.msra.mxu0 %v473_v33  ;;  %v489_v56 = vpack.c.bf16 %v37_v55, %v36_v54  ;;  %v492_v59 = vpack.c.bf16 %v136_v58, %v135_v57  ;;  %v298_v5 = vld [vmem:[%s710_s2 + $0x8] sm:$0xff]  ;;  %v300_v6 = vld [vmem:[%s710_s2 + $0x18] sm:$0xff]  ;;  %v297_v7 = vld [vmem:[%s710_s2] sm:$0xff] }
  0x12   :  { %476 = vmatprep.subr.bf16.mxu0 %v475_v34  ;;  %v494_v8 = vpack.c.bf16 %v300_v6, %v298_v5  ;;  %v299_v9 = vld [vmem:[%s710_s2 + $0x10] sm:$0xff]  ;;  %s507_s2 = scalar_lea.vmem %s395_s19, 64 }
  0x13   :  { %493 = vmatpush3.bf16.msra.mxu1 %v492_v59  ;;  %v496_v10 = vpack.c.bf16 %v299_v9, %v297_v7  ;;  %p508_p0 = scmp.ne.s32.totalorder %s395_s19, %s507_s2  ;;  %p513_p2 = scmp.lt.s32.totalorder %s507_s2, %s507_s2 }
  0x14   :  { %454 = vmatprep.subr.mxu1 %v534_v61 }
  0x15   :  { %478 = vmatpush3.bf16.msra.mxu0 %v477_v40  ;;  %p514_p3 = por %p513_p2, %p512_p1 }
  0x16   :  { %480 = vmatprep.subr.bf16.mxu0 %v479_v41 }
  0x17   :  { %p515_p4 = pnand %p514_p3, %p508_p0 }
  0x19   :  { %482 = vmatpush3.bf16.msra.mxu0 %v481_v46 }
  0x1a   :  { %484 = vmatprep.subr.bf16.mxu0 %v483_v47 }
  0x1d   :  { %486 = vmatpush3.bf16.msra.mxu0 %v485_v52 }
  0x1e   :  { %488 = vmatprep.subr.bf16.mxu0 %v487_v53 }
  0x21   :  { %490 = vmatpush3.bf16.msra.mxu0 %v489_v56 }
  0x24   :  { %130 = vmatmul.mubr.f32.vlgmr.msra.gmra.mrb[0].mxu0 %v61_v32 }
  0xf7   :  { %v439_v62 = vpop.f32.mrb[0].mxu0 }
  0xf8   :  { %v440_v63 = vpop.f32.mrb[1].mxu0 }
  0xf9   :  { %v441_v0 = vadd.f32 %v440_v63, %v439_v62 }
  0xfb   :  { %452 = vmatmul.mubr.msk.f32.vlgmr.msra.gmra.mrb[0].mxu1 %vm138_vm1, %v441_v0 }
  0xfc   :  { %455 = vmatpush3.msk.msra.mxu1 %vm217_vm2, %v137_v1  ;;  %456 = vmatprep.mubr.msk.f32.mxu1 %vm533_vm0, %v534_v61 }
  0xfd   :  { %495 = vmatprep.subr.bf16.mxu1 %v494_v8 }
 0x1ce   :  { %v208_v2 = vpop.f32.mrb[0].mxu1 }
 0x1cf   :  { %v212_v3 = vmax.f32 %v208_v2, 0.0  ;;  %v453_v4 = vpop.f32.mrb[1].mxu1 }
 0x1d1   :  { %457 = vmatmul.mubr.msk.f32.vlgmr.msra.gmra.mrb[2].mxu1 %vm213_vm3, %v212_v3 }
 0x1d2   :  { %368 = vmatprep.mubr.f32.mxu1 %v534_v61  ;;  %497 = vmatpush1.bf16.msra.mxu1 %v496_v10 }
 0x2a4   :  { %v287_v11 = vpop.f32.mrb[2].mxu1 }
 0x2a5   :  { %v405_v12 = vmul.f32 -1.442695, %v287_v11  ;;  %v458_v13 = vpop.f32.mrb[3].mxu1 }
 0x2a7   :  { %503 = vpow2.f32 %v405_v12 }
 0x2b1   :  { %v504_v14 = vpop.eup %503 }
 0x2b2   :  { %v294_v15 = vadd.f32 1.0, %v504_v14 }
 0x2b4   :  { %505 = vrcp.f32 %v294_v15 }
 0x2be   :  { %v506_v16 = vpop.eup %505 }
 0x2bf   :  { %406 = vmatmul.mubr.msk.f32.vlgmr.msra.gmra.mrb[4].mxu1 %vm138_vm1, %v506_v16 }
 0x392   :  { %v370_v17 = vpop.f32.mrb[4].mxu1 }
 0x393   :  { %v372_v18 = vpop.f32.mrb[5].mxu1 }
 0x394   :  { %v377_v19 = vcombine.low %v370_v17, %v372_v18 }
 0x396   :  { %v384_v20 = vrot.slane %v377_v19, %v608_v24 }
 0x398   :  { %v386_v21 = vmul.f32 %v384_v20, %v625_v31 }
 0x39a   :  { %387 = vst [vmem:[#allocation2] sm:$0xf] %v386_v21 }
 0x39b   :  { %518 = shalt.err (!%p515_p4)
}
 0x39c   :  { %s519_s22 = scalar_lea.hbm %s713_s5, 64 }
 0x39d   :  { %p520_p5 = scmp.ne.s32.totalorder %s713_s5, %s519_s22  ;;  %p523_p6 = scmp.lt.u32.totalorder %s519_s22, %s713_s5 }
 0x39f   :  { %p525_p7 = pnand %p523_p6, %p520_p5 }
 0x3a1   :  { %528 = shalt.err (!%p525_p7)
}
 0x3a2   :  { %397 = dma.vmem_to_hbm [thread:$0]  %s395_s19, 64, %s713_s5, [#allocation3]  }
 0x3a3   :  { %529 = dma.done.wait [#allocation3], 64  }
 0x3a4   :  { %530 = vsyncadd [#allocation3], 4294967232 }
 0x3a5   :  { %401 = vsyncpa [#allocation3], 1 }

</bundles_post_ra>
